<compile_context>
chip_gen: v5e
topology: v5e:2x2
jax: 0.10.0
libtpu: 0.0.40
codegen_flags: <defaults>
</compile_context>

<pallas_src>
import functools
import math

import numpy as np

import jax
import jax.numpy as jnp
from jax import lax
from jax.experimental import pallas as pl
from jax.experimental.pallas import tpu as pltpu


# ------------------------------ Pallas kernel ------------------------------ #

def _sigmoid(x):
    # exp on EUP + approximate reciprocal on EUP: keeps the divide off the VPU
    # on the serial per-step gate chain (executed T + pred_step times).
    return pl.reciprocal(1.0 + jnp.exp(-x), approx=True)


def _dpc_fused_kernel(x_ref, finf_ref, wx3_ref, bx3_ref, whh3_ref, bp1_ref,
                      woh_ref, wp2_ref, bp2_ref, score_ref, h_sc, xg_sc, *, t_agg):
    """One step of the fused DPC recurrence. grid=(T + pred_step,), sequential.

    x_ref   : (B, LS2, F)   observed feature at timestep min(t, T-1)  (pre-ReLU)
    finf_ref: (K, F) bf16   pre-ReLU future features (score RHS), K = B*PS*LS2
    wx3     : (F, 3F) bf16  [Wrx|Wux|Wox]     x-side gate weights
    bx3     : (1, 3F)       gate biases (folded on the x side)
    whh3    : (F, 3F) bf16  [Wp1|Wrh|Wuh]     pred-head L1 packed with h-side
                                              gate weights -> ONE MXU push/step
    bp1/wp2/bp2             pred head layer-1 bias / layer-2 weight+bias
    score_ref: (B, LS2, K)  per-AR-step score slab (step-indexed out block)
    h_sc    : (P, F) f32    recurrent hidden state (resident in VMEM)
    xg_sc   : (P, 3F) f32   per-step x-side gate pre-activations
    """
    Fh = woh_ref.shape[0]
    t = pl.program_id(0)

    @pl.when(t == 0)
    def _():
        h_sc[...] = jnp.zeros_like(h_sc)

    h = h_sc[...]                                                     # (P, F) f32

    # h-side projection shared by both phases: [h@Wp1 | h@Wrh | h@Wuh]
    hh = jnp.dot(h.astype(jnp.bfloat16), whh3_ref[...],
                 preferred_element_type=jnp.float32)                  # (P, 3F)
    gh = hh[:, Fh:]                                                   # (P, 2F)

    @pl.when(t < t_agg)
    def _():
        # Aggregation phase: GRU input is relu(feature_t).
        x = jnp.maximum(x_ref[...], 0.0).reshape(h.shape).astype(jnp.bfloat16)
        xg_sc[...] = (jnp.dot(x, wx3_ref[...], preferred_element_type=jnp.float32)
                      + bx3_ref[...])

    @pl.when(t >= t_agg)
    def _():
        # Autoregressive phase: pred head, score slab, GRU input = relu(pred).
        y = jnp.maximum(hh[:, :Fh] + bp1_ref[...], 0.0)               # (P, F)
        p = (jnp.dot(y.astype(jnp.bfloat16), wp2_ref[...],
                     preferred_element_type=jnp.float32) + bp2_ref[...])
        # score slab: p @ finf^T  (rhs contracting dim = 1, no transpose copy)
        s = lax.dot_general(p.astype(jnp.bfloat16), finf_ref[...],
                            dimension_numbers=(((1,), (1,)), ((), ())),
                            preferred_element_type=jnp.float32)       # (P, K)
        score_ref[...] = s.reshape(score_ref.shape).astype(score_ref.dtype)
        xp = jnp.maximum(p, 0.0).astype(jnp.bfloat16)
        xg_sc[...] = (jnp.dot(xp, wx3_ref[...], preferred_element_type=jnp.float32)
                      + bx3_ref[...])

    # ConvGRU gate math (shared by both phases; f32 — safe on v5e's f32 VPU/EUP).
    # The update after the final prediction step is dead work -> skip it.
    @pl.when(t < pl.num_programs(0) - 1)
    def _():
        xg = xg_sc[...]
        r = _sigmoid(xg[:, :Fh] + gh[:, :Fh])
        u = _sigmoid(xg[:, Fh:2 * Fh] + gh[:, Fh:2 * Fh])
        c = jnp.tanh(xg[:, 2 * Fh:] +
                     jnp.dot((h * r).astype(jnp.bfloat16), woh_ref[...],
                             preferred_element_type=jnp.float32))
        h_sc[...] = h * (1.0 - u) + u * c


# ----------------------------- kernel wrapper ------------------------------ #

def dpc_fused(feat_nat, feat_inf_bf, weights, *, t_agg, pred_step):
    B, N, LS2, F = feat_nat.shape
    P = B * LS2
    K = feat_inf_bf.shape[0]
    wx3, bx3, whh3, bp1, woh, wp2, bp2 = weights

    const = lambda t: (0, 0)
    kernel = functools.partial(_dpc_fused_kernel, t_agg=t_agg)

    return pl.pallas_call(
        kernel,
        out_shape=jax.ShapeDtypeStruct((B, pred_step, LS2, K), jnp.float32),
        grid=(t_agg + pred_step,),
        in_specs=[
            # observed feature slice, natural layout; index clamps during AR
            # phase so no new DMA is issued once the aggregation is done.
            pl.BlockSpec((B, None, LS2, F),
                         lambda t: (0, jnp.minimum(t, t_agg - 1), 0, 0)),
            pl.BlockSpec((K, F), const),            # future features (resident)
            pl.BlockSpec((F, 3 * F), const),        # wx3
            pl.BlockSpec((1, 3 * F), const),        # bx3
            pl.BlockSpec((F, 3 * F), const),        # whh3 = [Wp1|Wrh|Wuh]
            pl.BlockSpec((1, F), const),            # bp1
            pl.BlockSpec((F, F), const),            # woh
            pl.BlockSpec((F, F), const),            # wp2
            pl.BlockSpec((1, F), const),            # bp2
        ],
        # Per-AR-step score slab; index stays clamped at 0 through the
        # aggregation phase (block 0 is first flushed only after AR step 0
        # has written it).
        out_specs=pl.BlockSpec((B, None, LS2, K),
                               lambda t: (0, jnp.maximum(t - t_agg, 0), 0, 0)),
        scratch_shapes=[pltpu.VMEM((P, F), jnp.float32),
                        pltpu.VMEM((P, 3 * F), jnp.float32)],
        compiler_params=pltpu.CompilerParams(dimension_semantics=("arbitrary",)),
    )(feat_nat, feat_inf_bf, wx3, bx3, whh3, bp1, woh, wp2, bp2)


# ------------------------------- glue (JAX) -------------------------------- #

def dpc_rnn_forward(block, params, *, num_seq, seq_len, pred_step,
                    sample_size, feature_size):
    B, N, C, SL, H, W = block.shape
    LD = int(math.ceil(seq_len / 4))          # last_duration
    LS = int(math.ceil(sample_size / 32))     # last_size
    F = feature_size
    PS = pred_step
    LS2 = LS * LS
    T = N - PS

    g = params["gru"]
    pp = params["pred"]
    # bf16 copies of MXU weight operands (f32 masters kept for the f32 math).
    wx3_bf = g["wx3"].astype(jnp.bfloat16)
    whh3_bf = jnp.concatenate([pp["w1"], g["wh2"]], axis=1).astype(jnp.bfloat16)
    woh_bf = g["woh"].astype(jnp.bfloat16)
    wp2_bf = pp["w2"].astype(jnp.bfloat16)

    # --- stand-in backbone: pooled /4 temporal, /32 spatial + 1x1x1 conv proj ---
    # The channel projection (K = C = 3) is deliberately left to XLA: too small
    # for the MXU, a dedicated pallas_call here is pure launch overhead.
    x = block.reshape(B * N, C, SL, H, W)
    tp, sp = SL // LD, H // LS
    x = x.reshape(B * N, C, LD, tp, LS, sp, LS, sp).mean(axis=(3, 5, 7))  # (BN,C,LD,LS,LS)
    # avg_pool3d over the temporal dim (kernel = last_duration) -> T = 1; the
    # projection is linear so pooling first is exactly equivalent (and cheaper).
    x = x.mean(axis=2)                                                    # (BN,C,LS,LS)
    x = jnp.transpose(x, (0, 2, 3, 1)).reshape(B * N * LS2, C)            # pixel-last
    feat = jnp.dot(x, params["proj_w"]) + params["proj_b"]                # (BN*LS2, F)
    feat_nat = feat.reshape(B, N, LS2, F)                                 # pre-ReLU

    # Pre-ReLU future features for the score (rows ordered (B, PS, LS2)).
    feat_inf_bf = feat_nat[:, N - PS:].reshape(B * PS * LS2, F).astype(jnp.bfloat16)

    # --- one fused pallas_call: aggregation + AR prediction + score ---
    score = dpc_fused(feat_nat, feat_inf_bf,
                      (wx3_bf, g["bx3"], whh3_bf, pp["b1"], woh_bf, wp2_bf, pp["b2"]),
                      t_agg=T, pred_step=PS)                              # (B,PS,LS2,K)
    return score.reshape(B, PS, LS2, B, PS, LS2)


def make_mask_np(B, PS, LS2):
    """Input-independent mask, built once on the host (mirrors the PyTorch int8 logic)."""
    N = PS
    mask = np.zeros((B, PS, LS2, B, N, LS2), dtype=np.int8)
    mask[np.arange(B), :, :, np.arange(B), :, :] = -3
    for k in range(B):
        mask[k, :, np.arange(LS2), k, :, np.arange(LS2)] = -1
    tmp = mask.transpose(0, 2, 1, 3, 5, 4).reshape(B * LS2, PS, B * LS2, N).copy()
    for j in range(B * LS2):
        tmp[j, np.arange(PS), j, np.arange(N - PS, N)] = 1
    mask = tmp.reshape(B, LS2, PS, B, LS2, N).transpose(0, 2, 1, 3, 5, 4)
    return jnp.asarray(mask)


# ----------------------------- parameter init ------------------------------ #

def init_params(key, C, F):
    orth = jax.nn.initializers.orthogonal()
    ks = jax.random.split(key, 6)

    def gate(k):  # Conv2d(2F, F, 1) weight, stored transposed and split into x/h parts
        w = orth(k, (2 * F, F), jnp.float32)
        return w[:F], w[F:]

    wrx, wrh = gate(ks[0])
    wux, wuh = gate(ks[1])
    wox, woh = gate(ks[2])
    zb = jnp.zeros((1, F), jnp.float32)
    return {
        "proj_w": orth(ks[3], (C, F), jnp.float32),
        "proj_b": jnp.zeros((1, F), jnp.float32),
        "gru": {
            "wx3": jnp.concatenate([wrx, wux, wox], axis=1),    # (F, 3F) [reset|update|out]
            "bx3": jnp.zeros((1, 3 * F), jnp.float32),          # gate biases folded here
            "wh2": jnp.concatenate([wrh, wuh], axis=1),         # (F, 2F) [reset|update]
            "woh": woh,                                         # (F, F)
        },
        "pred": {"w1": orth(ks[4], (F, F), jnp.float32), "b1": zb,
                 "w2": orth(ks[5], (F, F), jnp.float32), "b2": zb},
    }


# ---------------------------------- main ----------------------------------- #

if __name__ == "__main__":
    B, num_seq, C, seq_len = 2, 8, 3, 4
    sample_size, pred_step, feature_size = 64, 3, 32
    H = W = sample_size
    LS = int(math.ceil(sample_size / 32))
    LS2 = LS * LS

    key = jax.random.PRNGKey(0)
    kb, kp = jax.random.split(key)
    block = jax.random.normal(kb, (B, num_seq, C, seq_len, H, W), jnp.float32)
    params = init_params(kp, C, feature_size)

    fwd = jax.jit(functools.partial(
        dpc_rnn_forward, num_seq=num_seq, seq_len=seq_len, pred_step=pred_step,
        sample_size=sample_size, feature_size=feature_size))

    score = fwd(block, params)
    mask = make_mask_np(B, pred_step, LS2)
    jax.block_until_ready((score, mask))

    assert score.shape == (B, pred_step, LS2, B, pred_step, LS2)
    assert score.dtype == jnp.float32
    assert bool(jnp.all(jnp.isfinite(score)))
    assert mask.shape == (B, pred_step, LS2, B, pred_step, LS2)
    assert mask.dtype == jnp.int8
    print("KERNEL_OK")
</pallas_src>

<mosaic_0001>
module attributes {stable_mosaic.version = 11 : i64} {
  func.func @_dpc_fused_kernel(%arg0: i32, %arg1: memref<2x1x4x32xf32, #tpu.memory_space<vmem>>, %arg2: memref<24x32xbf16, #tpu.memory_space<vmem>>, %arg3: memref<32x96xbf16, #tpu.memory_space<vmem>>, %arg4: memref<1x96xf32, #tpu.memory_space<vmem>>, %arg5: memref<32x96xbf16, #tpu.memory_space<vmem>>, %arg6: memref<1x32xf32, #tpu.memory_space<vmem>>, %arg7: memref<32x32xbf16, #tpu.memory_space<vmem>>, %arg8: memref<32x32xbf16, #tpu.memory_space<vmem>>, %arg9: memref<1x32xf32, #tpu.memory_space<vmem>>, %arg10: memref<2x1x4x24xf32, #tpu.memory_space<vmem>>, %arg11: memref<8x32xf32, #tpu.memory_space<vmem>>, %arg12: memref<8x96xf32, #tpu.memory_space<vmem>>) attributes {dimension_semantics = [#tpu.dimension_semantics<arbitrary>], iteration_bounds = array<i64: 8>, scalar_prefetch = 0 : i64, scratch_operands = 2 : i64, tpu.core_type = #tpu.core_type<tc>, window_params = [{transform_indices = @transform_0, window_bounds = array<i64: 2, 1, 4, 32>}, {pipeline_mode = #tpu.pipeline_mode<synchronous>, transform_indices = @transform_1, window_bounds = array<i64: 24, 32>}, {pipeline_mode = #tpu.pipeline_mode<synchronous>, transform_indices = @transform_2, window_bounds = array<i64: 32, 96>}, {pipeline_mode = #tpu.pipeline_mode<synchronous>, transform_indices = @transform_3, window_bounds = array<i64: 1, 96>}, {pipeline_mode = #tpu.pipeline_mode<synchronous>, transform_indices = @transform_4, window_bounds = array<i64: 32, 96>}, {pipeline_mode = #tpu.pipeline_mode<synchronous>, transform_indices = @transform_5, window_bounds = array<i64: 1, 32>}, {pipeline_mode = #tpu.pipeline_mode<synchronous>, transform_indices = @transform_6, window_bounds = array<i64: 32, 32>}, {pipeline_mode = #tpu.pipeline_mode<synchronous>, transform_indices = @transform_7, window_bounds = array<i64: 32, 32>}, {pipeline_mode = #tpu.pipeline_mode<synchronous>, transform_indices = @transform_8, window_bounds = array<i64: 1, 32>}, {transform_indices = @transform_9, window_bounds = array<i64: 2, 1, 4, 24>}]} {
    %c0_i32 = arith.constant 0 : i32
    %0 = arith.cmpi eq, %arg0, %c0_i32 : i32
    %1 = arith.extui %0 : i1 to i32
    %c0_i32_0 = arith.constant 0 : i32
    %2 = arith.cmpi ne, %1, %c0_i32_0 : i32
    scf.if %2 {
      %cst_8 = arith.constant 0.000000e+00 : f32
      %17 = vector.broadcast %cst_8 : f32 to vector<8x32xf32>
      %c0_9 = arith.constant 0 : index
      %c0_10 = arith.constant 0 : index
      %18 = vector.load %arg11[%c0_9, %c0_10] : memref<8x32xf32, #tpu.memory_space<vmem>>, vector<8x32xf32>
      tpu.vector_store %arg11[%c0_9, %c0_10], %17 {strides = array<i32>} : memref<8x32xf32, #tpu.memory_space<vmem>>, vector<8x32xf32>,
    } else {
    }
    %c0 = arith.constant 0 : index
    %c0_1 = arith.constant 0 : index
    %3 = vector.load %arg11[%c0, %c0_1] : memref<8x32xf32, #tpu.memory_space<vmem>>, vector<8x32xf32>
    %4 = arith.truncf %3 : vector<8x32xf32> to vector<8x32xbf16>
    %c0_2 = arith.constant 0 : index
    %c0_3 = arith.constant 0 : index
    %5 = vector.load %arg5[%c0_2, %c0_3] : memref<32x96xbf16, #tpu.memory_space<vmem>>, vector<32x96xbf16>
    %cst = arith.constant dense<0.000000e+00> : vector<8x96xf32>
    %6 = tpu.matmul %4, %5, %cst {dimension_numbers = #tpu.dot_dimension_numbers<[1], [0], [0], [1], [0, 0, 1, 1], [], []>} : vector<8x32xbf16>, vector<32x96xbf16>, vector<8x96xf32> -> vector<8x96xf32>
    %7 = vector.extract_strided_slice %6 {offsets = [0, 32], sizes = [8, 64], strides = [1, 1]} : vector<8x96xf32> to vector<8x64xf32>
    %c5_i32 = arith.constant 5 : i32
    %8 = arith.cmpi slt, %arg0, %c5_i32 : i32
    %9 = arith.extui %8 : i1 to i32
    %c0_i32_4 = arith.constant 0 : i32
    %10 = arith.cmpi ne, %9, %c0_i32_4 : i32
    scf.if %10 {
      %c0_8 = arith.constant 0 : index
      %c0_9 = arith.constant 0 : index
      %c0_10 = arith.constant 0 : index
      %c0_11 = arith.constant 0 : index
      %17 = vector.load %arg1[%c0_8, %c0_9, %c0_10, %c0_11] : memref<2x1x4x32xf32, #tpu.memory_space<vmem>>, vector<2x1x4x32xf32>
      %18 = vector.shape_cast %17 : vector<2x1x4x32xf32> to vector<2x4x32xf32>
      %cst_12 = arith.constant 0.000000e+00 : f32
      %19 = vector.broadcast %cst_12 : f32 to vector<2x4x32xf32>
      %20 = arith.maximumf %18, %19 : vector<2x4x32xf32>
      %21 = vector.shape_cast %20 : vector<2x4x32xf32> to vector<8x32xf32>
      %22 = arith.truncf %21 : vector<8x32xf32> to vector<8x32xbf16>
      %c0_13 = arith.constant 0 : index
      %c0_14 = arith.constant 0 : index
      %23 = vector.load %arg3[%c0_13, %c0_14] : memref<32x96xbf16, #tpu.memory_space<vmem>>, vector<32x96xbf16>
      %cst_15 = arith.constant dense<0.000000e+00> : vector<8x96xf32>
      %24 = tpu.matmul %22, %23, %cst_15 {dimension_numbers = #tpu.dot_dimension_numbers<[1], [0], [0], [1], [0, 0, 1, 1], [], []>} : vector<8x32xbf16>, vector<32x96xbf16>, vector<8x96xf32> -> vector<8x96xf32>
      %c0_16 = arith.constant 0 : index
      %c0_17 = arith.constant 0 : index
      %25 = vector.load %arg4[%c0_16, %c0_17] : memref<1x96xf32, #tpu.memory_space<vmem>>, vector<1x96xf32>
      %26 = vector.broadcast %25 : vector<1x96xf32> to vector<8x96xf32>
      %27 = arith.addf %24, %26 : vector<8x96xf32>
      %c0_18 = arith.constant 0 : index
      %c0_19 = arith.constant 0 : index
      %28 = vector.load %arg12[%c0_18, %c0_19] : memref<8x96xf32, #tpu.memory_space<vmem>>, vector<8x96xf32>
      tpu.vector_store %arg12[%c0_18, %c0_19], %27 {strides = array<i32>} : memref<8x96xf32, #tpu.memory_space<vmem>>, vector<8x96xf32>,
    } else {
    }
    %c5_i32_5 = arith.constant 5 : i32
    %11 = arith.cmpi sge, %arg0, %c5_i32_5 : i32
    %12 = arith.extui %11 : i1 to i32
    %c0_i32_6 = arith.constant 0 : i32
    %13 = arith.cmpi ne, %12, %c0_i32_6 : i32
    scf.if %13 {
      %17 = vector.extract_strided_slice %6 {offsets = [0, 0], sizes = [8, 32], strides = [1, 1]} : vector<8x96xf32> to vector<8x32xf32>
      %c0_8 = arith.constant 0 : index
      %c0_9 = arith.constant 0 : index
      %18 = vector.load %arg6[%c0_8, %c0_9] : memref<1x32xf32, #tpu.memory_space<vmem>>, vector<1x32xf32>
      %19 = vector.broadcast %18 : vector<1x32xf32> to vector<8x32xf32>
      %20 = arith.addf %17, %19 : vector<8x32xf32>
      %cst_10 = arith.constant 0.000000e+00 : f32
      %21 = vector.broadcast %cst_10 : f32 to vector<8x32xf32>
      %22 = arith.maximumf %20, %21 : vector<8x32xf32>
      %23 = arith.truncf %22 : vector<8x32xf32> to vector<8x32xbf16>
      %c0_11 = arith.constant 0 : index
      %c0_12 = arith.constant 0 : index
      %24 = vector.load %arg8[%c0_11, %c0_12] : memref<32x32xbf16, #tpu.memory_space<vmem>>, vector<32x32xbf16>
      %cst_13 = arith.constant dense<0.000000e+00> : vector<8x32xf32>
      %25 = tpu.matmul %23, %24, %cst_13 {dimension_numbers = #tpu.dot_dimension_numbers<[1], [0], [0], [1], [0, 0, 1, 1], [], []>} : vector<8x32xbf16>, vector<32x32xbf16>, vector<8x32xf32> -> vector<8x32xf32>
      %c0_14 = arith.constant 0 : index
      %c0_15 = arith.constant 0 : index
      %26 = vector.load %arg9[%c0_14, %c0_15] : memref<1x32xf32, #tpu.memory_space<vmem>>, vector<1x32xf32>
      %27 = vector.broadcast %26 : vector<1x32xf32> to vector<8x32xf32>
      %28 = arith.addf %25, %27 : vector<8x32xf32>
      %29 = arith.truncf %28 : vector<8x32xf32> to vector<8x32xbf16>
      %c0_16 = arith.constant 0 : index
      %c0_17 = arith.constant 0 : index
      %30 = vector.load %arg2[%c0_16, %c0_17] : memref<24x32xbf16, #tpu.memory_space<vmem>>, vector<24x32xbf16>
      %cst_18 = arith.constant dense<0.000000e+00> : vector<8x24xf32>
      %31 = tpu.matmul %29, %30, %cst_18 {dimension_numbers = #tpu.dot_dimension_numbers<[1], [1], [0], [0], [0, 0, 1, 0], [], []>} : vector<8x32xbf16>, vector<24x32xbf16>, vector<8x24xf32> -> vector<8x24xf32>
      %32 = vector.shape_cast %31 : vector<8x24xf32> to vector<2x4x24xf32>
      %c0_19 = arith.constant 0 : index
      %c0_20 = arith.constant 0 : index
      %c0_21 = arith.constant 0 : index
      %c0_22 = arith.constant 0 : index
      %33 = vector.load %arg10[%c0_19, %c0_20, %c0_21, %c0_22] : memref<2x1x4x24xf32, #tpu.memory_space<vmem>>, vector<2x1x4x24xf32>
      %34 = vector.shape_cast %33 : vector<2x1x4x24xf32> to vector<2x4x24xf32>
      %35 = vector.shape_cast %32 : vector<2x4x24xf32> to vector<2x1x4x24xf32>
      tpu.vector_store %arg10[%c0_19, %c0_20, %c0_21, %c0_22], %35 {strides = array<i32>} : memref<2x1x4x24xf32, #tpu.memory_space<vmem>>, vector<2x1x4x24xf32>,
      %cst_23 = arith.constant 0.000000e+00 : f32
      %36 = vector.broadcast %cst_23 : f32 to vector<8x32xf32>
      %37 = arith.maximumf %28, %36 : vector<8x32xf32>
      %38 = arith.truncf %37 : vector<8x32xf32> to vector<8x32xbf16>
      %c0_24 = arith.constant 0 : index
      %c0_25 = arith.constant 0 : index
      %39 = vector.load %arg3[%c0_24, %c0_25] : memref<32x96xbf16, #tpu.memory_space<vmem>>, vector<32x96xbf16>
      %cst_26 = arith.constant dense<0.000000e+00> : vector<8x96xf32>
      %40 = tpu.matmul %38, %39, %cst_26 {dimension_numbers = #tpu.dot_dimension_numbers<[1], [0], [0], [1], [0, 0, 1, 1], [], []>} : vector<8x32xbf16>, vector<32x96xbf16>, vector<8x96xf32> -> vector<8x96xf32>
      %c0_27 = arith.constant 0 : index
      %c0_28 = arith.constant 0 : index
      %41 = vector.load %arg4[%c0_27, %c0_28] : memref<1x96xf32, #tpu.memory_space<vmem>>, vector<1x96xf32>
      %42 = vector.broadcast %41 : vector<1x96xf32> to vector<8x96xf32>
      %43 = arith.addf %40, %42 : vector<8x96xf32>
      %c0_29 = arith.constant 0 : index
      %c0_30 = arith.constant 0 : index
      %44 = vector.load %arg12[%c0_29, %c0_30] : memref<8x96xf32, #tpu.memory_space<vmem>>, vector<8x96xf32>
      tpu.vector_store %arg12[%c0_29, %c0_30], %43 {strides = array<i32>} : memref<8x96xf32, #tpu.memory_space<vmem>>, vector<8x96xf32>,
    } else {
    }
    %c7_i32 = arith.constant 7 : i32
    %14 = arith.cmpi slt, %arg0, %c7_i32 : i32
    %15 = arith.extui %14 : i1 to i32
    %c0_i32_7 = arith.constant 0 : i32
    %16 = arith.cmpi ne, %15, %c0_i32_7 : i32
    scf.if %16 {
      %c0_8 = arith.constant 0 : index
      %c0_9 = arith.constant 0 : index
      %17 = vector.load %arg12[%c0_8, %c0_9] : memref<8x96xf32, #tpu.memory_space<vmem>>, vector<8x96xf32>
      %18 = vector.extract_strided_slice %17 {offsets = [0, 0], sizes = [8, 32], strides = [1, 1]} : vector<8x96xf32> to vector<8x32xf32>
      %19 = vector.extract_strided_slice %7 {offsets = [0, 0], sizes = [8, 32], strides = [1, 1]} : vector<8x64xf32> to vector<8x32xf32>
      %20 = arith.addf %18, %19 : vector<8x32xf32>
      %cst_10 = arith.constant 0.000000e+00 : f32
      %21 = vector.broadcast %cst_10 : f32 to vector<8x32xf32>
      %22 = arith.subf %21, %20 : vector<8x32xf32>
      %23 = math.exp %22 : vector<8x32xf32>
      %cst_11 = arith.constant 1.000000e+00 : f32
      %24 = vector.broadcast %cst_11 : f32 to vector<8x32xf32>
      %25 = arith.addf %24, %23 : vector<8x32xf32>
      %26 = tpu.reciprocal %25 {approx = true} : vector<8x32xf32> -> vector<8x32xf32>
      %27 = vector.extract_strided_slice %17 {offsets = [0, 32], sizes = [8, 32], strides = [1, 1]} : vector<8x96xf32> to vector<8x32xf32>
      %28 = vector.extract_strided_slice %7 {offsets = [0, 32], sizes = [8, 32], strides = [1, 1]} : vector<8x64xf32> to vector<8x32xf32>
      %29 = arith.addf %27, %28 : vector<8x32xf32>
      %cst_12 = arith.constant 0.000000e+00 : f32
      %30 = vector.broadcast %cst_12 : f32 to vector<8x32xf32>
      %31 = arith.subf %30, %29 : vector<8x32xf32>
      %32 = math.exp %31 : vector<8x32xf32>
      %cst_13 = arith.constant 1.000000e+00 : f32
      %33 = vector.broadcast %cst_13 : f32 to vector<8x32xf32>
      %34 = arith.addf %33, %32 : vector<8x32xf32>
      %35 = tpu.reciprocal %34 {approx = true} : vector<8x32xf32> -> vector<8x32xf32>
      %36 = vector.extract_strided_slice %17 {offsets = [0, 64], sizes = [8, 32], strides = [1, 1]} : vector<8x96xf32> to vector<8x32xf32>
      %37 = arith.mulf %3, %26 : vector<8x32xf32>
      %38 = arith.truncf %37 : vector<8x32xf32> to vector<8x32xbf16>
      %c0_14 = arith.constant 0 : index
      %c0_15 = arith.constant 0 : index
      %39 = vector.load %arg7[%c0_14, %c0_15] : memref<32x32xbf16, #tpu.memory_space<vmem>>, vector<32x32xbf16>
      %cst_16 = arith.constant dense<0.000000e+00> : vector<8x32xf32>
      %40 = tpu.matmul %38, %39, %cst_16 {dimension_numbers = #tpu.dot_dimension_numbers<[1], [0], [0], [1], [0, 0, 1, 1], [], []>} : vector<8x32xbf16>, vector<32x32xbf16>, vector<8x32xf32> -> vector<8x32xf32>
      %41 = arith.addf %36, %40 : vector<8x32xf32>
      %42 = math.tanh %41 : vector<8x32xf32>
      %cst_17 = arith.constant 1.000000e+00 : f32
      %43 = vector.broadcast %cst_17 : f32 to vector<8x32xf32>
      %44 = arith.subf %43, %35 : vector<8x32xf32>
      %45 = arith.mulf %3, %44 : vector<8x32xf32>
      %46 = arith.mulf %35, %42 : vector<8x32xf32>
      %47 = arith.addf %45, %46 : vector<8x32xf32>
      %c0_18 = arith.constant 0 : index
      %c0_19 = arith.constant 0 : index
      %48 = vector.load %arg11[%c0_18, %c0_19] : memref<8x32xf32, #tpu.memory_space<vmem>>, vector<8x32xf32>
      tpu.vector_store %arg11[%c0_18, %c0_19], %47 {strides = array<i32>} : memref<8x32xf32, #tpu.memory_space<vmem>>, vector<8x32xf32>,
    } else {
    }
    return
  }
  func.func @transform_0(%arg0: i32) -> (i32, i32, i32, i32) {
    %c4_i32 = arith.constant 4 : i32
    %0 = arith.minsi %arg0, %c4_i32 : i32
    %c0_i32 = arith.constant 0 : i32
    %c0_i32_0 = arith.constant 0 : i32
    %c0_i32_1 = arith.constant 0 : i32
    %c0_i32_2 = arith.constant 0 : i32
    return %c0_i32, %0, %c0_i32_0, %c0_i32_1 : i32, i32, i32, i32
  }
  func.func @transform_1(%arg0: i32) -> (i32, i32) {
    %c0_i32 = arith.constant 0 : i32
    %c0_i32_0 = arith.constant 0 : i32
    %c0_i32_1 = arith.constant 0 : i32
    return %c0_i32, %c0_i32_0 : i32, i32
  }
  func.func @transform_2(%arg0: i32) -> (i32, i32) {
    %c0_i32 = arith.constant 0 : i32
    %c0_i32_0 = arith.constant 0 : i32
    %c0_i32_1 = arith.constant 0 : i32
    return %c0_i32, %c0_i32_0 : i32, i32
  }
  func.func @transform_3(%arg0: i32) -> (i32, i32) {
    %c0_i32 = arith.constant 0 : i32
    %c0_i32_0 = arith.constant 0 : i32
    %c0_i32_1 = arith.constant 0 : i32
    return %c0_i32, %c0_i32_0 : i32, i32
  }
  func.func @transform_4(%arg0: i32) -> (i32, i32) {
    %c0_i32 = arith.constant 0 : i32
    %c0_i32_0 = arith.constant 0 : i32
    %c0_i32_1 = arith.constant 0 : i32
    return %c0_i32, %c0_i32_0 : i32, i32
  }
  func.func @transform_5(%arg0: i32) -> (i32, i32) {
    %c0_i32 = arith.constant 0 : i32
    %c0_i32_0 = arith.constant 0 : i32
    %c0_i32_1 = arith.constant 0 : i32
    return %c0_i32, %c0_i32_0 : i32, i32
  }
  func.func @transform_6(%arg0: i32) -> (i32, i32) {
    %c0_i32 = arith.constant 0 : i32
    %c0_i32_0 = arith.constant 0 : i32
    %c0_i32_1 = arith.constant 0 : i32
    return %c0_i32, %c0_i32_0 : i32, i32
  }
  func.func @transform_7(%arg0: i32) -> (i32, i32) {
    %c0_i32 = arith.constant 0 : i32
    %c0_i32_0 = arith.constant 0 : i32
    %c0_i32_1 = arith.constant 0 : i32
    return %c0_i32, %c0_i32_0 : i32, i32
  }
  func.func @transform_8(%arg0: i32) -> (i32, i32) {
    %c0_i32 = arith.constant 0 : i32
    %c0_i32_0 = arith.constant 0 : i32
    %c0_i32_1 = arith.constant 0 : i32
    return %c0_i32, %c0_i32_0 : i32, i32
  }
  func.func @transform_9(%arg0: i32) -> (i32, i32, i32, i32) {
    %c5_i32 = arith.constant 5 : i32
    %0 = arith.subi %arg0, %c5_i32 : i32
    %c0_i32 = arith.constant 0 : i32
    %1 = arith.maxsi %0, %c0_i32 : i32
    %c0_i32_0 = arith.constant 0 : i32
    %c0_i32_1 = arith.constant 0 : i32
    %c0_i32_2 = arith.constant 0 : i32
    %c0_i32_3 = arith.constant 0 : i32
    return %c0_i32_0, %1, %c0_i32_1, %c0_i32_2 : i32, i32, i32, i32
  }
}

</mosaic_0001>

<bundles_post_ra>
// kernel: dpc_rnn_forward.1
= control target key start
LH: loop header
LB: loop body
LE: loop exit
PB: predicated region body
PF: predicated region fallthrough
CT: control target
= control target key end

     0   :  { %s1026_s30 = smov 0   ;;  %s1028_s10 = smov 0   ;;  %s1199_s0 = inlined_call_operand.vmem [shape: f32[2,8,4,32], index: 0, kind: input, shape index: {}]   ;;  %s1200_s1 = inlined_call_operand.vmem [shape: bf16[24,32], index: 1, kind: input, shape index: {}]   ;;  %s1201_s2 = inlined_call_operand.vmem [shape: bf16[32,96], index: 2, kind: input, shape index: {}]   ;;  %s1202_s3 = inlined_call_operand.vmem [shape: f32[1,96], index: 3, kind: input, shape index: {}]   ;;  %s1203_s4 = inlined_call_operand.vmem [shape: bf16[32,96], index: 4, kind: input, shape index: {}]   ;;  %s1204_s5 = inlined_call_operand.vmem [shape: f32[1,32], index: 5, kind: input, shape index: {}]   ;;  %s1205_s6 = inlined_call_operand.vmem [shape: bf16[32,32], index: 6, kind: input, shape index: {}]   ;;  %s1206_s7 = inlined_call_operand.vmem [shape: bf16[32,32], index: 7, kind: input, shape index: {}]   ;;  %s1207_s8 = inlined_call_operand.vmem [shape: f32[1,32], index: 8, kind: input, shape index: {}]   ;;  %s1208_s9 = inlined_call_operand.vmem [shape: f32[2,3,4,24], index: 9, kind: output, shape index: {}]  }
   0x1   :  { %s1030_s11 = smov 0   ;;  %s1032_s12 = smov 0  }
   0x2   :  { %s1034_s13 = smov 0  }
   0x3 LB: > { %s1052_s14 = sadd.s32 4294967295, %s971_s13   ;;  %s1055_s15 = sadd.s32 1, %s971_s13   ;;  %s971_s13 = sphi %s1034_s13, %s1217_s13   ;;  %s967_s12 = sphi %s1032_s12, %s1216_s12   ;;  %s963_s11 = sphi %s1030_s11, %s1215_s11   ;;  %s959_s10 = sphi %s1028_s10, %s1214_s10   ;;  %s955_s30 = sphi %s1026_s30, %s1213_s30  }
   0x4   : > { %p23_p0 = scmp.lt.s32.totalorder %s971_s13, 4  ;;  %p25_p1 = scmp.lt.s32.totalorder %s1055_s15, 4 }
   0x5   : > { %s30_s16 = sadd.s32 1, %s967_s12  ;;  %p37_p2 = scmp.ne.s32.totalorder %s967_s12, %s963_s11 }
   0x6   : > { %s24_s17 = scalar_select %p23_p0, %s971_s13, 4 }
   0x7   : > { %s26_s18 = scalar_select %p25_p1, %s1055_s15, 4 }
   0x8   : > { %p38_p3 = scmp.eq.s32.totalorder %s971_s13, 0  ;;  %s801_s19 = sadd.s32 4294967291, %s971_s13 }
   0x9   : > { %s27_s20 = ssub.s32 %s24_s17, %s26_s18  ;;  %p222_p4 = scmp.gt.s32.totalorder %s801_s19, 0 }
   0xa   : > { %p28_p5 = scmp.eq.s32.totalorder %s27_s20, 0  ;;  %p1066_p6 = por %p38_p3, %p37_p2 }
   0xb   : > { %s1219_s19 = smov (!%p222_p4, %s801_s19), 0  ;;  %s802_s23 = sadd.s32 4294967291, %s1055_s15 }
   0xc   : > { %s1071_s22 = scalar_select %p28_p5, %s967_s12, %s30_s16  }
   0xd   : > { %p225_p7 = scmp.gt.s32.totalorder %s802_s23, 0  ;;  %p240_p8 = scmp.ne.s32.totalorder %s959_s10, %s955_s30 }
   0xe   : > { %1210 = sst [smem:[#allocation6_spill]] %s1071_s22  ;;  %p241_p9 = scmp.eq.s32.totalorder %s1052_s14, 7 }
   0xf   : > { %s1221_s23 = smov (!%p225_p7, %s802_s23), 0  ;;  %s230_s26 = sadd.s32 1, %s959_s10 }
  0x10   : > { %p1077_p10 = por %p241_p9, %p240_p8  ;;  %s227_s25 = ssub.s32 %s1219_s19, %s1221_s23 }
  0x11   : > { %p228_p11 = scmp.eq.s32.totalorder %s227_s25, 0  ;;  %p804_p12 = scmp.ge.s32.totalorder %s971_s13, 8 }
  0x13   : > { %s1083_s27 = scalar_select %p228_p11, %s959_s10, %s230_s26  }
  0x14   : > { %287 = sbr.rel (%p804_p12) target bundleno = 31 (0x1f), region = 48 }
  0x19   : > { %290 = sbr.rel (!%p1066_p6) target bundleno = 31 (0x1f), region = 52  ;;  %s292_s28 = sand.u32 (%p1066_p6), 1, %s967_s12  }
  0x1a   : > { %s806_s29 = sshll.u32 (%p1066_p6), %s24_s17, 2  ;;  %s805_s16 = sshll.u32 (%p1066_p6), %s292_s28, 3 }
  0x1b   : > { %s298_s22 = scalar_lea.vmem (%p1066_p6), %s1199_s0, %s806_s29  ;;  %s294_s19 = scalar_lea.vmem (%p1066_p6), [#allocation4], %s805_s16 }
  0x1c   : > { %v315_v0 = vld [vmem:[%s298_s22] sm:$0xf] (%p1066_p6) }
  0x1d   : > { %v317_v1 = vld [vmem:[%s298_s22 + $0x20] sm:$0xf] (%p1066_p6)  ;;  %316 = vst [vmem:[%s294_s19] sm:$0xf] (%p1066_p6), %v315_v0 }
  0x1e   : > { %318 = vst [vmem:[%s294_s19 + $0x4] sm:$0xf] %v317_v1 }
  0x1f PF: > { %p807_p13 = scmp.ge.s32.totalorder %s971_s13, 1  ;;  %p345_p0 = scmp.lt.s32.totalorder %s971_s13, 9 }
  0x21   : > { %p346_p1 = pnand %p807_p13, %p345_p0 }
  0x22   : > { %s352_s17 = sand.u32 (!%p346_p1), 1, %s963_s11   ;;  %s383_s21 = sand.u32 (!%p346_p1), 1, %s955_s30  }
  0x23   : > { %349 = sbr.rel (%p346_p1) target bundleno = 1244 (0x4dc), region = 93  ;;  %s808_s23 = sshll.u32 (!%p346_p1), %s352_s17, 3 }
  0x24   : > { %s809_s25 = sshll.u32 (!%p346_p1), %s383_s21, 3  ;;  %s354_s26 = scalar_lea.vmem (!%p346_p1), [#allocation4], %s808_s23 }
  0x25   : > { %s1096_s28 = scalar_lea.vmem (!%p346_p1), [#allocation5], %s809_s25  ;;  %p810_p2 = scmp.ne.s32.totalorder (!%p346_p1), %s1052_s14, 0 }
  0x28   : > { %395 = sbr.rel (%p810_p2) target bundleno = 47 (0x2f), region = 101 }
  0x2d   : > { %vm396_vm0 = vcmask 261120   ;;  %v973_v2 = vmov 0.0  }
  0x2e   : > { %397 = vst.msk [vmem:[#allocation2] sm:$0xff] %vm396_vm0, %v973_v2 }
  0x2f PF: > { %v870_v3 = vld [vmem:[%s1203_s4 + $0x8] sm:$0xff]  ;;  %v869_v4 = vld [vmem:[%s1203_s4] sm:$0xff]  ;;  %vm416_vm1 = vcmask 261120   ;;  %p820_p3 = scmp.ge.s32.totalorder %s1052_s14, 5 }
  0x30   : > { %426 = vmatpush.bf16.msra.mxu0 %v870_v3 }
  0x34   : > { %427 = vmatpush.bf16.msra.mxu0 %v869_v4 }
  0x35   : > { %v1105_v5 = vld [vmem:[#allocation2] sm:$0xff] }
  0x36   : > { %v399_v6 = vpack.c.bf16 %v1105_v5, %v1105_v5 }
  0x38   : > { %819 = vmatmul.msk.bf16.vlgmr.msra.gmra.mxu0 %vm416_vm1, %v399_v6 }
  0xb5   : > { %v1110_v7 = vpop.f32.mrf.mxu0 }
  0xb9   : > { %436 = sbr.rel (%p820_p3) target bundleno = 338 (0x152), region = 105 }
  0xbd   : > { %v431_v8 = vpop.f32.mrf.mxu0 }
  0xbe   : > { %v872_v9 = vld [vmem:[%s1201_s2 + $0x8] sm:$0xff]  ;;  %v437_v10 = vld [vmem:[%s354_s26] sm:$0xf]  ;;  %v438_v11 = vld [vmem:[%s354_s26 + $0x4] sm:$0xf]  ;;  %vm485_vm2 = vcmask 785408  }
  0xbf   : > { %v439_v12 = vmax.f32 %v437_v10, 0.0  ;;  %478 = vmatpush.bf16.msra.mxu0 %v872_v9  ;;  %v871_v13 = vld [vmem:[%s1201_s2] sm:$0xff]  ;;  %v440_v14 = vmax.f32 %v438_v11, 0.0 }
  0xc0   : > { %v923_v17 = vld [vmem:[%s1202_s3] ss:$0 sm:$0xff] }
  0xc1   : > { %443 = vst [vmem:[#allocation1] ss:$2 sm:$0xff] %v439_v12 }
  0xc2   : > { %445 = vst [vmem:[#allocation1 + $0x1] ss:$2 sm:$0xff] %v440_v14 }
  0xc3   : > { %479 = vmatpush.bf16.msra.mxu0 %v871_v13 }
  0xc9   : > { %v446_v15 = vld.sshfl [vmem:[#allocation1] sm:$0xff pattern:$0x75316420] }
  0xca   : > { %v448_v16 = vpack.c.bf16 %v446_v15, %v446_v15 }
  0xcc   : > { %829 = vmatmul.msk.bf16.vlgmr.msra.gmra.mxu0 %vm416_vm1, %v448_v16 }
 0x149   : > { %v481_v18 = vpop.f32.mrf.mxu0 }
 0x14a   : > { %v482_v19 = vadd.f32 %v923_v17, %v481_v18 }
 0x14c   : > { %486 = vst.msk [vmem:[#allocation3] sm:$0xff] %vm485_vm2, %v482_v19 }
 0x151   : > { %v483_v20 = vpop.f32.mrf.mxu0 }
 0x152 PF: > { %p830_p4 = scmp.lt.s32.totalorder %s1052_s14, 5 }
 0x154   : > { %490 = sbr.rel (%p830_p4) target bundleno = 625 (0x271), region = 109 }
 0x159   : > { %v874_v21 = vld [vmem:[%s1206_s7 + $0x8] sm:$0xff]  ;;  %v924_v22 = vld [vmem:[%s1204_s5] ss:$0 sm:$0xff]  ;;  %vm571_vm3 = vcmask 191488   ;;  %vm612_vm4 = vcmask 785408  }
 0x15a   : > { %v537_v23 = vld [vmem:[%s1200_s1 + $0x8] sm:$0xf]  ;;  %527 = vmatpush.bf16.msra.mxu0 %v874_v21  ;;  %v873_v24 = vld [vmem:[%s1206_s7] sm:$0xff]  ;;  %v495_v26 = vadd.f32 %v924_v22, %v1110_v7 }
 0x15b   : > { %v543_v25 = vunpack.c.l.b16 %v537_v23  ;;  %v875_v31 = vld [vmem:[%s1200_s1] sm:$0xff]  ;;  %v877_v33 = vld [vmem:[%s1201_s2 + $0x8] sm:$0xff] }
 0x15c   : > { %v496_v28 = vmax.f32 %v495_v26, 0.0  ;;  %v550_v32 = vsel %vm416_vm1, %v875_v31, 0  ;;  %605 = vmatpush.bf16.msra.mxu2 %v877_v33  ;;  %v876_v34 = vld [vmem:[%s1201_s2] sm:$0xff] }
 0x15d   : > { %v545_v27 = vpack.c.b16 %v543_v25, %v543_v25  ;;  %v925_v35 = vld [vmem:[%s1207_s8] ss:$0 sm:$0xff] }
 0x15e   : > { %528 = vmatpush.bf16.msra.mxu0 %v873_v24  ;;  %v497_v30 = vpack.c.bf16 %v496_v28, %v496_v28  ;;  %v926_v44 = vld [vmem:[%s1202_s3] ss:$0 sm:$0xff] }
 0x15f   : > { %v553_v29 = vsel %vm416_vm1, %v545_v27, 0 }
 0x160   : > { %561 = vmatpush.bf16.xpose.msra.mxu1 %v553_v29  ;;  %606 = vmatpush.bf16.msra.mxu2 %v876_v34 }
 0x161   : > { %839 = vmatmul.msk.bf16.vlgmr.msra.gmra.mxu0 %vm416_vm1, %v497_v30 }
 0x168   : > { %562 = vmatpush.bf16.xpose.msra.mxu1 %v550_v32 }
 0x1de   : > { %v530_v36 = vpop.f32.mrf.mxu0 }
 0x1df   : > { %v531_v37 = vadd.f32 %v925_v35, %v530_v36 }
 0x1e1   : > { %v534_v38 = vpack.c.bf16 %v531_v37, %v531_v37  ;;  %v574_v39 = vmax.f32 %v531_v37, 0.0 }
 0x1e3   : > { %844 = vmatmul.msk.bf16.vlgmr.msra.gmra.mxu1 %vm416_vm1, %v534_v38  ;;  %v575_v40 = vpack.c.bf16 %v574_v39, %v574_v39 }
 0x1e5   : > { %853 = vmatmul.msk.bf16.vlgmr.msra.gmra.mxu2 %vm416_vm1, %v575_v40 }
 0x1e6   : > { %v532_v41 = vpop.f32.mrf.mxu0 }
 0x260   : > { %v564_v42 = vpop.f32.mrf.mxu1 }
 0x261   : > { %v569_v43 = vrot.slane %v564_v42, 4  ;;  %572 = vst.msk [vmem:[%s1096_s28] sm:$0xf] %vm571_vm3, %v564_v42 }
 0x263   : > { %573 = vst.msk [vmem:[%s1096_s28 + $0x4] sm:$0xf] %vm571_vm3, %v569_v43 }
 0x268   : > { %v566_v45 = vpop.f32.mrf.mxu1  ;;  %v608_v46 = vpop.f32.mrf.mxu2 }
 0x269   : > { %v609_v47 = vadd.f32 %v926_v44, %v608_v46 }
 0x26b   : > { %613 = vst.msk [vmem:[#allocation3] sm:$0xff] %vm612_vm4, %v609_v47 }
 0x270   : > { %v610_v48 = vpop.f32.mrf.mxu2 }
 0x271 PF: > { %p854_p5 = scmp.ge.s32.totalorder %s1052_s14, 7 }
 0x272   : > { %s974_s22 = smov (!%p854_p5), 96   ;;  %s975_s16 = smov (!%p854_p5), 64  }
 0x273   : > { %617 = sbr.rel (%p854_p5) target bundleno = 1234 (0x4d2), region = 113 }
 0x278   : > { %620 = vrot.lane.b32.xlu0 %v1110_v7, %s974_s22  ;;  %v879_v49 = vld [vmem:[%s1205_s6 + $0x8] sm:$0xff]  ;;  %v878_v50 = vld [vmem:[%s1205_s6] sm:$0xff]  ;;  %v618_v51 = vld [vmem:[#allocation3] sm:$0xff] }
 0x279   : > { %656 = vmatpush.bf16.msra.mxu0 %v879_v49 }
 0x27d   : > { %657 = vmatpush.bf16.msra.mxu0 %v878_v50 }
 0x2ea   : > { %v621_v52 = vpop.permute.xlu0 %620 }
 0x2eb   : > { %v623_v53 = vadd.f32 %v621_v52, %v618_v51 }
 0x2ed   : > { %v624_v54 = vsub.f32 0.0, %v623_v53 }
 0x2ef   : > { %v625_v55 = vmul.f32 1.442695, %v624_v54 }
 0x2f1   : > { %927 = vpow2.f32 %v625_v55 }
 0x2f7   : > { %v928_v56 = vpop.eup %927 }
 0x2f8   : > { %v627_v57 = vadd.f32 1.0, %v928_v56 }
 0x2fa   : > { %929 = vrcp.f32 %v627_v57 }
 0x300   : > { %v930_v58 = vpop.eup %929 }
 0x301   : > { %v629_v59 = vmul.f32 %v930_v58, %v1105_v5  ;;  %v669_v2 = vsub.f32 1.0, %v930_v58 }
 0x303   : > { %v630_v60 = vpack.c.bf16 %v629_v59, %v629_v59 }
 0x305   : > { %863 = vmatmul.msk.bf16.vlgmr.msra.gmra.mxu0 %vm416_vm1, %v630_v60 }
 0x382   : > { %v659_v61 = vpop.f32.mrf.mxu0 }
 0x383   : > { %664 = vrot.lane.b32.xlu0 %v659_v61, %s975_s16 }
 0x38a   : > { %v661_v62 = vpop.f32.mrf.mxu0 }
 0x3f5   : > { %v665_v63 = vpop.permute.xlu0 %664 }
 0x3f6   : > { %v667_v0 = vadd.f32 %v665_v63, %v618_v51 }
 0x3f8   : > { %931 = vtanh.f32 %v667_v0 }
 0x3fe   : > { %v932_v1 = vpop.eup %931 }
 0x3ff   : > { %676 = vrot.lane.b32.xlu1 %v932_v1, %s974_s22 }
 0x407   : > { %671 = vrot.lane.b32.xlu1 %v669_v2, %s974_s22 }
 0x471   : > { %v677_v3 = vpop.permute.xlu1 %676 }
 0x472   : > { %v679_v4 = vmul.f32 %v930_v58, %v677_v3 }
 0x474   : > { %681 = vrot.lane.b32.xlu2 %v679_v4, %s974_s22 }
 0x479   : > { %v672_v6 = vpop.permute.xlu1 %671 }
 0x47a   : > { %v674_v7 = vmul.f32 %v672_v6, %v1105_v5 }
 0x4ce   : > { %v682_v8 = vpop.permute.xlu2 %681 }
 0x4cf   : > { %v684_v9 = vadd.f32 %v682_v8, %v674_v7 }
 0x4d1   : > { %685 = vst.msk [vmem:[#allocation2] sm:$0xff] %vm416_vm1, %v684_v9 }
 0x4d2 PF: > { %692 = sbr.rel (!%p1077_p10) target bundleno = 1244 (0x4dc), region = 117  ;;  %s865_s18 = sadd.s32 (%p1077_p10), 4294967291, %s1052_s14  ;;  %v714_v10 = vld [vmem:[%s1096_s28] sm:$0xf] (%p1077_p10)  ;;  %v716_v11 = vld [vmem:[%s1096_s28 + $0x4] sm:$0xf] (%p1077_p10) }
 0x4d3   : > { %p694_p6 = scmp.gt.s32.totalorder (%p1077_p10), %s865_s18, 0 }
 0x4d7   : > { %s1223_s18 = smov (!%p694_p6, %s865_s18), 0 }
 0x4d8   : > { %s866_s20 = sshll.u32 %s1223_s18, 2 }
 0x4d9   : > { %s697_s21 = scalar_lea.vmem %s1208_s9, %s866_s20 }
 0x4da   : > { %715 = vst [vmem:[%s697_s21] sm:$0xf] %v714_v10 }
 0x4db   : > { %717 = vst [vmem:[%s697_s21 + $0xc] sm:$0xf] %v716_v11 }
 0x4dc PF: > { %s1212_s24 = sld [smem:[#allocation6_spill]]  ;;  %p16_p7 = scmp.ge.s32.totalorder %s1055_s15, 10  }
 0x4dd   : > { %s1213_s30 = smov %s959_s10  ;;  %s1214_s10 = smov %s1083_s27 }
 0x4de   : > { %s1215_s11 = smov %s967_s12  ;;  %s1217_s13 = smov %s1055_s15 }
 0x4df   :  { %18 = sbr.rel (!%p16_p7) target bundleno = 3 (0x3), region = 190 }
 0x4e2   : > { %s1216_s12 = smov %s1212_s24 }

</bundles_post_ra>
